<compile_context>
chip_gen: v7x
topology: tpu7x:2x2x1
jax: 0.10.0
libtpu: 0.0.40
codegen_flags: <defaults>
</compile_context>

<pallas_src>
import functools

import jax
import jax.numpy as jnp
from jax.experimental import pallas as pl
from jax.experimental.pallas import tpu as pltpu

EPS = 1e-5


def _round_up(x, m):
    return ((x + m - 1) // m) * m


def layernorm_kernel(x_ref, w_ref, b_ref, o_ref):
    # x_ref: (TILE_R, H), w_ref/b_ref: (1, H)
    x = x_ref[...]
    if x.dtype != jnp.float32:
        x = x.astype(jnp.float32)
    inv_h = jnp.float32(1.0 / x.shape[-1])
    # Independent reductions (no serial mean -> centered -> var chain).
    s1 = jnp.sum(x, axis=-1, keepdims=True)
    s2 = jnp.sum(x * x, axis=-1, keepdims=True)
    mean = s1 * inv_h
    var = jnp.maximum(s2 * inv_h - mean * mean, 0.0)
    inv = jax.lax.rsqrt(var + EPS)
    y = (x - mean) * inv * w_ref[...] + b_ref[...]
    o_ref[...] = y.astype(o_ref.dtype)


@functools.partial(jax.jit, static_argnames=("max_tile_r",))
def layernorm(x, weight, bias, *, max_tile_r=512):
    """x: (B, S, H); weight, bias: (H,). Returns (B, S, H)."""
    B, S, H = x.shape
    R = B * S
    x2 = x.reshape(R, H)

    # Row tile: multiple of 8 (f32 sublane), capped for VMEM; pad R to fit.
    tile_r = min(max_tile_r, _round_up(R, 8))
    r_pad = _round_up(R, tile_r)
    if r_pad != R:
        x2 = jnp.pad(x2, ((0, r_pad - R), (0, 0)))

    w2 = weight.reshape(1, H).astype(jnp.float32)
    b2 = bias.reshape(1, H).astype(jnp.float32)

    out2 = pl.pallas_call(
        layernorm_kernel,
        out_shape=jax.ShapeDtypeStruct((r_pad, H), x.dtype),
        grid_spec=pltpu.PrefetchScalarGridSpec(
            num_scalar_prefetch=0,
            grid=(r_pad // tile_r,),
            in_specs=[
                pl.BlockSpec((tile_r, H), lambda i: (i, 0)),
                pl.BlockSpec((1, H), lambda i: (0, 0)),  # VMEM-resident weight
                pl.BlockSpec((1, H), lambda i: (0, 0)),  # VMEM-resident bias
            ],
            out_specs=pl.BlockSpec((tile_r, H), lambda i: (i, 0)),
        ),
        compiler_params=pltpu.CompilerParams(
            dimension_semantics=("parallel",),  # rows are independent
        ),
    )(x2, w2, b2)

    return out2[:R].reshape(B, S, H)


if __name__ == "__main__":
    key = jax.random.PRNGKey(0)
    # Shapes implied by the module: hidden_states = (1, 2, 10), LayerNorm(10).
    hidden_states = jax.random.uniform(key, (1, 2, 10), dtype=jnp.float32)

    # torch.nn.LayerNorm default parameters: weight=1, bias=0.
    weight = jnp.ones((10,), dtype=jnp.float32)
    bias = jnp.zeros((10,), dtype=jnp.float32)

    out = layernorm(hidden_states, weight, bias)
    jax.block_until_ready(out)

    # Sanity check against a pure-JAX reference.
    x = hidden_states.astype(jnp.float32)
    mean = jnp.mean(x, axis=-1, keepdims=True)
    var = jnp.mean((x - mean) ** 2, axis=-1, keepdims=True)
    ref = (x - mean) * jax.lax.rsqrt(var + EPS) * weight + bias
    assert out.shape == (1, 2, 10)
    assert jnp.allclose(out, ref, atol=1e-5, rtol=1e-5)

    print("KERNEL_OK")
</pallas_src>

<mosaic_0001>
module attributes {stable_mosaic.version = 11 : i64} {
  func.func @layernorm_kernel(%arg0: i32, %arg1: memref<8x10xf32, #tpu.memory_space<vmem>>, %arg2: memref<1x10xf32, #tpu.memory_space<vmem>>, %arg3: memref<1x10xf32, #tpu.memory_space<vmem>>, %arg4: memref<8x10xf32, #tpu.memory_space<vmem>>) attributes {dimension_semantics = [#tpu.dimension_semantics<parallel>], iteration_bounds = array<i64: 1>, scalar_prefetch = 0 : i64, scratch_operands = 0 : i64, tpu.core_type = #tpu.core_type<tc>, window_params = [{transform_indices = @transform_0, window_bounds = array<i64: 8, 10>}, {pipeline_mode = #tpu.pipeline_mode<synchronous>, transform_indices = @transform_1, window_bounds = array<i64: 1, 10>}, {pipeline_mode = #tpu.pipeline_mode<synchronous>, transform_indices = @transform_2, window_bounds = array<i64: 1, 10>}, {transform_indices = @transform_3, window_bounds = array<i64: 8, 10>}]} {
    %c0 = arith.constant 0 : index
    %c0_0 = arith.constant 0 : index
    %0 = vector.load %arg1[%c0, %c0_0] : memref<8x10xf32, #tpu.memory_space<vmem>>, vector<8x10xf32>
    %cst = arith.constant dense<0.000000e+00> : vector<8xf32>
    %1 = vector.multi_reduction <add>, %0, %cst [1] : vector<8x10xf32> to vector<8xf32>
    %2 = vector.shape_cast %1 : vector<8xf32> to vector<8x1xf32>
    %3 = arith.mulf %0, %0 : vector<8x10xf32>
    %cst_1 = arith.constant dense<0.000000e+00> : vector<8xf32>
    %4 = vector.multi_reduction <add>, %3, %cst_1 [1] : vector<8x10xf32> to vector<8xf32>
    %5 = vector.shape_cast %4 : vector<8xf32> to vector<8x1xf32>
    %cst_2 = arith.constant 1.000000e-01 : f32
    %6 = vector.broadcast %cst_2 : f32 to vector<8x1xf32>
    %7 = arith.mulf %2, %6 : vector<8x1xf32>
    %cst_3 = arith.constant 1.000000e-01 : f32
    %8 = vector.broadcast %cst_3 : f32 to vector<8x1xf32>
    %9 = arith.mulf %5, %8 : vector<8x1xf32>
    %10 = arith.mulf %7, %7 : vector<8x1xf32>
    %11 = arith.subf %9, %10 : vector<8x1xf32>
    %cst_4 = arith.constant 0.000000e+00 : f32
    %12 = vector.broadcast %cst_4 : f32 to vector<8x1xf32>
    %13 = arith.maximumf %11, %12 : vector<8x1xf32>
    %cst_5 = arith.constant 9.99999974E-6 : f32
    %14 = vector.broadcast %cst_5 : f32 to vector<8x1xf32>
    %15 = arith.addf %13, %14 : vector<8x1xf32>
    %16 = math.rsqrt %15 : vector<8x1xf32>
    %17 = vector.broadcast %7 : vector<8x1xf32> to vector<8x10xf32>
    %18 = arith.subf %0, %17 : vector<8x10xf32>
    %19 = vector.broadcast %16 : vector<8x1xf32> to vector<8x10xf32>
    %20 = arith.mulf %18, %19 : vector<8x10xf32>
    %c0_6 = arith.constant 0 : index
    %c0_7 = arith.constant 0 : index
    %21 = vector.load %arg2[%c0_6, %c0_7] : memref<1x10xf32, #tpu.memory_space<vmem>>, vector<1x10xf32>
    %22 = vector.broadcast %21 : vector<1x10xf32> to vector<8x10xf32>
    %23 = arith.mulf %20, %22 : vector<8x10xf32>
    %c0_8 = arith.constant 0 : index
    %c0_9 = arith.constant 0 : index
    %24 = vector.load %arg3[%c0_8, %c0_9] : memref<1x10xf32, #tpu.memory_space<vmem>>, vector<1x10xf32>
    %25 = vector.broadcast %24 : vector<1x10xf32> to vector<8x10xf32>
    %26 = arith.addf %23, %25 : vector<8x10xf32>
    %c0_10 = arith.constant 0 : index
    %c0_11 = arith.constant 0 : index
    %27 = vector.load %arg4[%c0_10, %c0_11] : memref<8x10xf32, #tpu.memory_space<vmem>>, vector<8x10xf32>
    tpu.vector_store %arg4[%c0_10, %c0_11], %26 {strides = array<i32>} : memref<8x10xf32, #tpu.memory_space<vmem>>, vector<8x10xf32>,
    return
  }
  func.func @transform_0(%arg0: i32) -> (i32, i32) {
    %c0_i32 = arith.constant 0 : i32
    %c0_i32_0 = arith.constant 0 : i32
    return %arg0, %c0_i32 : i32, i32
  }
  func.func @transform_1(%arg0: i32) -> (i32, i32) {
    %c0_i32 = arith.constant 0 : i32
    %c0_i32_0 = arith.constant 0 : i32
    %c0_i32_1 = arith.constant 0 : i32
    return %c0_i32, %c0_i32_0 : i32, i32
  }
  func.func @transform_2(%arg0: i32) -> (i32, i32) {
    %c0_i32 = arith.constant 0 : i32
    %c0_i32_0 = arith.constant 0 : i32
    %c0_i32_1 = arith.constant 0 : i32
    return %c0_i32, %c0_i32_0 : i32, i32
  }
  func.func @transform_3(%arg0: i32) -> (i32, i32) {
    %c0_i32 = arith.constant 0 : i32
    %c0_i32_0 = arith.constant 0 : i32
    return %arg0, %c0_i32 : i32, i32
  }
}

</mosaic_0001>

<bundles_post_ra>
// kernel: layernorm.1
= control target key start
LH: loop header
LB: loop body
LE: loop exit
PB: predicated region body
PF: predicated region fallthrough
CT: control target
= control target key end

     0   :  { %vm15_vm0 = vcmask 80896   ;;  %s92_s0 = inlined_call_operand.vmem [shape: f32[8,10], index: 0, kind: input, shape index: {}]   ;;  %s93_s1 = inlined_call_operand.vmem [shape: f32[1,10], index: 1, kind: input, shape index: {}]   ;;  %s94_s2 = inlined_call_operand.vmem [shape: f32[1,10], index: 2, kind: input, shape index: {}]   ;;  %s95_s3 = inlined_call_operand.vmem [shape: f32[8,10], index: 3, kind: output, shape index: {}]  }
   0x1   :  { %v14_v0 = vld [vmem:[%s92_s0] sm:$0xff] }
   0x2   :  { %v16_v1 = vsel %vm15_vm0, %v14_v0, 0.0  ;;  %v19_v2 = vmul.f32 %v14_v0, %v14_v0  ;;  %v53_v14 = vld [vmem:[%s93_s1] ss:$0 sm:$0xff] }
   0x3   :  { %17 = vadd.xlane.f32.xlu0 %v16_v1  ;;  %v54_v16 = vld [vmem:[%s94_s2] ss:$0 sm:$0xff] }
   0x4   :  { %v20_v3 = vsel %vm15_vm0, %v19_v2, 0.0 }
   0x7   :  { %21 = vadd.xlane.f32.xlu0 %v20_v3 }
  0x90   :  { %v18_v4 = vpop.xlane.xlu0 %17 }
  0x91   :  { %v23_v5 = vmul.f32 0.1, %v18_v4 }
  0x93   :  { %v25_v7 = vmul.f32 %v23_v5, %v23_v5  ;;  %v30_v12 = vsub.f32 %v14_v0, %v23_v5 }
  0x94   :  { %v22_v6 = vpop.xlane.xlu0 %21 }
  0x95   :  { %v24_v8 = vmul.f32 0.1, %v22_v6 }
  0x97   :  { %v26_v9 = vsub.f32 %v24_v8, %v25_v7 }
  0x99   :  { %v27_v10 = vmax.f32 %v26_v9, 0.0 }
  0x9b   :  { %v28_v11 = vadd.f32 1e-05, %v27_v10 }
  0x9d   :  { %55 = vrsqrt.f32 %v28_v11 }
  0xa7   :  { %v56_v13 = vpop.eup %55 }
  0xa8   :  { %v31_v15 = vmul.f32 %v56_v13, %v30_v12 }
  0xaa   :  { %v39_v17 = vmul.f32 %v53_v14, %v31_v15 }
  0xac   :  { %v47_v18 = vadd.f32 %v54_v16, %v39_v17 }
  0xae   :  { %48 = vst.msk [vmem:[%s95_s3] sm:$0xff] %vm15_vm0, %v47_v18 }

</bundles_post_ra>
